<compile_context>
chip_gen: v6e
topology: v6e:2x2x1
jax: 0.10.0
libtpu: 0.0.40
codegen_flags: <defaults>
</compile_context>

<pallas_src>
import jax
import jax.numpy as jnp
from jax import lax
from jax.experimental import pallas as pl
from jax.experimental.pallas import tpu as pltpu

EPS = 1e-5
SLAB_ROWS, SLAB_COLS = 112, 36


def _bn_relu(h, gamma, beta):
    """Training-mode BatchNorm (biased batch stats) folded into scale+shift, then ReLU.

    Batch sums are computed with one tiny MXU matmul (MXU is idle at these
    shapes) instead of two XLU cross-sublane reductions.
    """
    B, F = h.shape
    inv_n = 1.0 / B
    both = jnp.concatenate([h, h * h], axis=-1)                     # (B, 2F) — fits in lanes
    sums = jnp.dot(jnp.ones((1, B), jnp.float32), both,
                   preferred_element_type=jnp.float32)              # (1, 2F) on the MXU
    mean = sums[:, :F] * inv_n
    mean_sq = sums[:, F:] * inv_n
    var = jnp.maximum(mean_sq - mean * mean, 0.0)                   # clamp one-pass variance
    s = gamma * lax.rsqrt(var + EPS)                                # rsqrt -> EUP (free slot)
    t = beta - mean * s
    return jnp.maximum(h * s + t, 0.0)                              # single scale+shift, relu


def _net_kernel(x_ref, p_ref, out_ref):
    x = x_ref[0]                                                    # (B, 48)

    # fc1 (bias omitted: exactly cancelled by the following training-mode BN)
    h = jnp.dot(x, p_ref[0:48, 0:36], preferred_element_type=jnp.float32)
    h = _bn_relu(h, p_ref[104:105, 0:36], p_ref[105:106, 0:36])

    # fc2 (bias omitted, same reason)
    h = jnp.dot(h, p_ref[48:84, 0:12], preferred_element_type=jnp.float32)
    h = _bn_relu(h, p_ref[106:107, 0:12], p_ref[107:108, 0:12])

    # fc3 (bias kept)
    out = jnp.dot(h, p_ref[88:100, 0:6], preferred_element_type=jnp.float32)
    out_ref[0] = (out + p_ref[108:109, 0:6]).astype(out_ref.dtype)


def net_forward_many(xs, param_slab):
    """xs: (N, B, 48) f32 — N independent Net forward calls fused into ONE launch.

    param_slab: (112, 36) f32 packed by pack_params(); DMA'd once, resident
    across all grid steps.
    """
    N, B, F_in = xs.shape
    assert F_in == 48

    flops = int(N * (2 * B * (48 * 36 + 36 * 12 + 12 * 6)      # three matmuls
                     + 2 * B * 2 * (36 + 12)))                  # BN stats matmuls
    bytes_accessed = int(4 * (xs.size + SLAB_ROWS * SLAB_COLS + N * B * 6))
    cost = pl.CostEstimate(flops=flops,
                           transcendentals=int(N * (36 + 12)),
                           bytes_accessed=bytes_accessed)

    return pl.pallas_call(
        _net_kernel,
        out_shape=jax.ShapeDtypeStruct((N, B, 6), jnp.float32),
        grid=(N,),
        in_specs=[
            pl.BlockSpec((1, B, 48), lambda i: (i, 0, 0)),            # per-step x tile
            pl.BlockSpec((SLAB_ROWS, SLAB_COLS), lambda i: (0, 0)),   # slab resident
        ],
        out_specs=pl.BlockSpec((1, B, 6), lambda i: (i, 0, 0)),
        compiler_params=pltpu.CompilerParams(
            dimension_semantics=("parallel",)),                       # v7x: shard across 2 TCs
        cost_estimate=cost,
    )(xs, param_slab)


def net_forward(x, param_slab):
    """Original module semantics: x (B, 48) -> (B, 6), training-mode BN."""
    return net_forward_many(x[None], param_slab)[0]


def pack_params(p):
    """Pack all kernel-visible parameters into one padded (112, 36) f32 slab."""
    slab = jnp.zeros((SLAB_ROWS, SLAB_COLS), jnp.float32)
    slab = slab.at[0:48, 0:36].set(p["w1"])
    slab = slab.at[48:84, 0:12].set(p["w2"])
    slab = slab.at[88:100, 0:6].set(p["w3"])
    slab = slab.at[104, 0:36].set(p["g1"])
    slab = slab.at[105, 0:36].set(p["be1"])
    slab = slab.at[106, 0:12].set(p["g2"])
    slab = slab.at[107, 0:12].set(p["be2"])
    slab = slab.at[108, 0:6].set(p["b3"])
    return slab


def init_params(key):
    """Deterministic init mimicking torch defaults (uniform(-1/sqrt(fan_in), ...))."""
    def linear(key, fan_in, fan_out):
        kw, kb = jax.random.split(key)
        bound = 1.0 / jnp.sqrt(fan_in)
        w = jax.random.uniform(kw, (fan_in, fan_out), jnp.float32, -bound, bound)
        b = jax.random.uniform(kb, (fan_out,), jnp.float32, -bound, bound)
        return w, b

    k1, k2, k3 = jax.random.split(key, 3)
    w1, b1 = linear(k1, 48, 36)
    w2, b2 = linear(k2, 36, 12)
    w3, b3 = linear(k3, 12, 6)
    return dict(
        w1=w1, b1=b1, g1=jnp.ones((36,), jnp.float32), be1=jnp.zeros((36,), jnp.float32),
        w2=w2, b2=b2, g2=jnp.ones((12,), jnp.float32), be2=jnp.zeros((12,), jnp.float32),
        w3=w3, b3=b3,
    )


def net_forward_ref(x, p):
    """Plain-JAX reference with full torch semantics (incl. pre-BN biases)."""
    h = x @ p["w1"] + p["b1"]
    m, v = jnp.mean(h, 0, keepdims=True), jnp.var(h, 0, keepdims=True)
    h = jnp.maximum((h - m) / jnp.sqrt(v + EPS) * p["g1"] + p["be1"], 0.0)
    h = h @ p["w2"] + p["b2"]
    m, v = jnp.mean(h, 0, keepdims=True), jnp.var(h, 0, keepdims=True)
    h = jnp.maximum((h - m) / jnp.sqrt(v + EPS) * p["g2"] + p["be2"], 0.0)
    return h @ p["w3"] + p["b3"]


if __name__ == "__main__":
    key = jax.random.PRNGKey(0)
    kx, kp = jax.random.split(key)

    N = 4   # number of independent forward calls fused into one launch
    B = 8   # batch per call (BatchNorm training mode needs B > 1)
    xs = jax.random.normal(kx, (N, B, 6 * 8), jnp.float32)   # (4, 8, 48)
    params = init_params(kp)
    slab = pack_params(params)   # packed once, reused across forward calls

    # Fused multi-call path (one launch, slab resident across grid steps).
    out = jax.block_until_ready(net_forward_many(xs, slab))
    ref = jax.vmap(lambda xb: net_forward_ref(xb, params))(xs)
    assert out.shape == (N, B, 6)
    assert jnp.allclose(out, ref, atol=2e-4, rtol=2e-4), "mismatch vs reference (batched)"

    # Single-call path (original module semantics).
    out1 = jax.block_until_ready(net_forward(xs[0], slab))
    assert out1.shape == (B, 6)
    assert jnp.allclose(out1, ref[0], atol=2e-4, rtol=2e-4), "mismatch vs reference (single)"

    print("KERNEL_OK")
</pallas_src>

<mosaic_0001>
module attributes {stable_mosaic.version = 11 : i64} {
  func.func @_net_kernel(%arg0: i32, %arg1: memref<1x8x48xf32, #tpu.memory_space<vmem>>, %arg2: memref<112x36xf32, #tpu.memory_space<vmem>>, %arg3: memref<1x8x6xf32, #tpu.memory_space<vmem>>) attributes {dimension_semantics = [#tpu.dimension_semantics<parallel>], iteration_bounds = array<i64: 4>, scalar_prefetch = 0 : i64, scratch_operands = 0 : i64, tpu.core_type = #tpu.core_type<tc>, window_params = [{transform_indices = @transform_0, window_bounds = array<i64: 1, 8, 48>}, {pipeline_mode = #tpu.pipeline_mode<synchronous>, transform_indices = @transform_1, window_bounds = array<i64: 112, 36>}, {transform_indices = @transform_2, window_bounds = array<i64: 1, 8, 6>}]} {
    %c0 = arith.constant 0 : index
    %c0_0 = arith.constant 0 : index
    %c0_1 = arith.constant 0 : index
    %0 = vector.load %arg1[%c0, %c0_0, %c0_1] : memref<1x8x48xf32, #tpu.memory_space<vmem>>, vector<1x8x48xf32>
    %1 = vector.shape_cast %0 : vector<1x8x48xf32> to vector<8x48xf32>
    %c0_2 = arith.constant 0 : index
    %c0_3 = arith.constant 0 : index
    %2 = vector.load %arg2[%c0_2, %c0_3] : memref<112x36xf32, #tpu.memory_space<vmem>>, vector<48x36xf32>
    %cst = arith.constant dense<0.000000e+00> : vector<8x36xf32>
    %3 = tpu.matmul %1, %2, %cst {dimension_numbers = #tpu.dot_dimension_numbers<[1], [0], [0], [1], [0, 0, 1, 1], [], []>} : vector<8x48xf32>, vector<48x36xf32>, vector<8x36xf32> -> vector<8x36xf32>
    %c104 = arith.constant 104 : index
    %c0_4 = arith.constant 0 : index
    %4 = vector.load %arg2[%c104, %c0_4] : memref<112x36xf32, #tpu.memory_space<vmem>>, vector<1x36xf32>
    %c105 = arith.constant 105 : index
    %c0_5 = arith.constant 0 : index
    %5 = vector.load %arg2[%c105, %c0_5] : memref<112x36xf32, #tpu.memory_space<vmem>>, vector<1x36xf32>
    %6 = arith.mulf %3, %3 : vector<8x36xf32>
    %7 = tpu.concatenate %3, %6 in 1 : vector<8x36xf32>, vector<8x36xf32> -> vector<8x72xf32>
    %cst_6 = arith.constant 1.000000e+00 : f32
    %8 = vector.broadcast %cst_6 : f32 to vector<1x8xf32>
    %cst_7 = arith.constant dense<0.000000e+00> : vector<1x72xf32>
    %9 = tpu.matmul %8, %7, %cst_7 {dimension_numbers = #tpu.dot_dimension_numbers<[1], [0], [0], [1], [0, 0, 1, 1], [], []>} : vector<1x8xf32>, vector<8x72xf32>, vector<1x72xf32> -> vector<1x72xf32>
    %10 = vector.extract_strided_slice %9 {offsets = [0, 0], sizes = [1, 36], strides = [1, 1]} : vector<1x72xf32> to vector<1x36xf32>
    %cst_8 = arith.constant 1.250000e-01 : f32
    %11 = vector.broadcast %cst_8 : f32 to vector<1x36xf32>
    %12 = arith.mulf %10, %11 : vector<1x36xf32>
    %13 = vector.extract_strided_slice %9 {offsets = [0, 36], sizes = [1, 36], strides = [1, 1]} : vector<1x72xf32> to vector<1x36xf32>
    %cst_9 = arith.constant 1.250000e-01 : f32
    %14 = vector.broadcast %cst_9 : f32 to vector<1x36xf32>
    %15 = arith.mulf %13, %14 : vector<1x36xf32>
    %16 = arith.mulf %12, %12 : vector<1x36xf32>
    %17 = arith.subf %15, %16 : vector<1x36xf32>
    %cst_10 = arith.constant 0.000000e+00 : f32
    %18 = vector.broadcast %cst_10 : f32 to vector<1x36xf32>
    %19 = arith.maximumf %17, %18 : vector<1x36xf32>
    %cst_11 = arith.constant 9.99999974E-6 : f32
    %20 = vector.broadcast %cst_11 : f32 to vector<1x36xf32>
    %21 = arith.addf %19, %20 : vector<1x36xf32>
    %22 = math.rsqrt %21 : vector<1x36xf32>
    %23 = arith.mulf %4, %22 : vector<1x36xf32>
    %24 = arith.mulf %12, %23 : vector<1x36xf32>
    %25 = arith.subf %5, %24 : vector<1x36xf32>
    %26 = vector.broadcast %23 : vector<1x36xf32> to vector<8x36xf32>
    %27 = arith.mulf %3, %26 : vector<8x36xf32>
    %28 = vector.broadcast %25 : vector<1x36xf32> to vector<8x36xf32>
    %29 = arith.addf %27, %28 : vector<8x36xf32>
    %cst_12 = arith.constant 0.000000e+00 : f32
    %30 = vector.broadcast %cst_12 : f32 to vector<8x36xf32>
    %31 = arith.maximumf %29, %30 : vector<8x36xf32>
    %c48 = arith.constant 48 : index
    %c0_13 = arith.constant 0 : index
    %32 = vector.load %arg2[%c48, %c0_13] : memref<112x36xf32, #tpu.memory_space<vmem>>, vector<36x12xf32>
    %cst_14 = arith.constant dense<0.000000e+00> : vector<8x12xf32>
    %33 = tpu.matmul %31, %32, %cst_14 {dimension_numbers = #tpu.dot_dimension_numbers<[1], [0], [0], [1], [0, 0, 1, 1], [], []>} : vector<8x36xf32>, vector<36x12xf32>, vector<8x12xf32> -> vector<8x12xf32>
    %c106 = arith.constant 106 : index
    %c0_15 = arith.constant 0 : index
    %34 = vector.load %arg2[%c106, %c0_15] : memref<112x36xf32, #tpu.memory_space<vmem>>, vector<1x12xf32>
    %c107 = arith.constant 107 : index
    %c0_16 = arith.constant 0 : index
    %35 = vector.load %arg2[%c107, %c0_16] : memref<112x36xf32, #tpu.memory_space<vmem>>, vector<1x12xf32>
    %36 = arith.mulf %33, %33 : vector<8x12xf32>
    %37 = tpu.concatenate %33, %36 in 1 : vector<8x12xf32>, vector<8x12xf32> -> vector<8x24xf32>
    %cst_17 = arith.constant 1.000000e+00 : f32
    %38 = vector.broadcast %cst_17 : f32 to vector<1x8xf32>
    %cst_18 = arith.constant dense<0.000000e+00> : vector<1x24xf32>
    %39 = tpu.matmul %38, %37, %cst_18 {dimension_numbers = #tpu.dot_dimension_numbers<[1], [0], [0], [1], [0, 0, 1, 1], [], []>} : vector<1x8xf32>, vector<8x24xf32>, vector<1x24xf32> -> vector<1x24xf32>
    %40 = vector.extract_strided_slice %39 {offsets = [0, 0], sizes = [1, 12], strides = [1, 1]} : vector<1x24xf32> to vector<1x12xf32>
    %cst_19 = arith.constant 1.250000e-01 : f32
    %41 = vector.broadcast %cst_19 : f32 to vector<1x12xf32>
    %42 = arith.mulf %40, %41 : vector<1x12xf32>
    %43 = vector.extract_strided_slice %39 {offsets = [0, 12], sizes = [1, 12], strides = [1, 1]} : vector<1x24xf32> to vector<1x12xf32>
    %cst_20 = arith.constant 1.250000e-01 : f32
    %44 = vector.broadcast %cst_20 : f32 to vector<1x12xf32>
    %45 = arith.mulf %43, %44 : vector<1x12xf32>
    %46 = arith.mulf %42, %42 : vector<1x12xf32>
    %47 = arith.subf %45, %46 : vector<1x12xf32>
    %cst_21 = arith.constant 0.000000e+00 : f32
    %48 = vector.broadcast %cst_21 : f32 to vector<1x12xf32>
    %49 = arith.maximumf %47, %48 : vector<1x12xf32>
    %cst_22 = arith.constant 9.99999974E-6 : f32
    %50 = vector.broadcast %cst_22 : f32 to vector<1x12xf32>
    %51 = arith.addf %49, %50 : vector<1x12xf32>
    %52 = math.rsqrt %51 : vector<1x12xf32>
    %53 = arith.mulf %34, %52 : vector<1x12xf32>
    %54 = arith.mulf %42, %53 : vector<1x12xf32>
    %55 = arith.subf %35, %54 : vector<1x12xf32>
    %56 = vector.broadcast %53 : vector<1x12xf32> to vector<8x12xf32>
    %57 = arith.mulf %33, %56 : vector<8x12xf32>
    %58 = vector.broadcast %55 : vector<1x12xf32> to vector<8x12xf32>
    %59 = arith.addf %57, %58 : vector<8x12xf32>
    %cst_23 = arith.constant 0.000000e+00 : f32
    %60 = vector.broadcast %cst_23 : f32 to vector<8x12xf32>
    %61 = arith.maximumf %59, %60 : vector<8x12xf32>
    %c88 = arith.constant 88 : index
    %c0_24 = arith.constant 0 : index
    %62 = vector.load %arg2[%c88, %c0_24] : memref<112x36xf32, #tpu.memory_space<vmem>>, vector<12x6xf32>
    %cst_25 = arith.constant dense<0.000000e+00> : vector<8x6xf32>
    %63 = tpu.matmul %61, %62, %cst_25 {dimension_numbers = #tpu.dot_dimension_numbers<[1], [0], [0], [1], [0, 0, 1, 1], [], []>} : vector<8x12xf32>, vector<12x6xf32>, vector<8x6xf32> -> vector<8x6xf32>
    %c108 = arith.constant 108 : index
    %c0_26 = arith.constant 0 : index
    %64 = vector.load %arg2[%c108, %c0_26] : memref<112x36xf32, #tpu.memory_space<vmem>>, vector<1x6xf32>
    %65 = vector.broadcast %64 : vector<1x6xf32> to vector<8x6xf32>
    %66 = arith.addf %63, %65 : vector<8x6xf32>
    %c0_27 = arith.constant 0 : index
    %c0_28 = arith.constant 0 : index
    %c0_29 = arith.constant 0 : index
    %67 = vector.load %arg3[%c0_27, %c0_28, %c0_29] : memref<1x8x6xf32, #tpu.memory_space<vmem>>, vector<1x8x6xf32>
    %68 = vector.shape_cast %67 : vector<1x8x6xf32> to vector<8x6xf32>
    %69 = vector.shape_cast %66 : vector<8x6xf32> to vector<1x8x6xf32>
    tpu.vector_store %arg3[%c0_27, %c0_28, %c0_29], %69 {strides = array<i32>} : memref<1x8x6xf32, #tpu.memory_space<vmem>>, vector<1x8x6xf32>,
    return
  }
  func.func @transform_0(%arg0: i32) -> (i32, i32, i32) {
    %c0_i32 = arith.constant 0 : i32
    %c0_i32_0 = arith.constant 0 : i32
    %c0_i32_1 = arith.constant 0 : i32
    return %arg0, %c0_i32, %c0_i32_0 : i32, i32, i32
  }
  func.func @transform_1(%arg0: i32) -> (i32, i32) {
    %c0_i32 = arith.constant 0 : i32
    %c0_i32_0 = arith.constant 0 : i32
    %c0_i32_1 = arith.constant 0 : i32
    return %c0_i32, %c0_i32_0 : i32, i32
  }
  func.func @transform_2(%arg0: i32) -> (i32, i32, i32) {
    %c0_i32 = arith.constant 0 : i32
    %c0_i32_0 = arith.constant 0 : i32
    %c0_i32_1 = arith.constant 0 : i32
    return %arg0, %c0_i32, %c0_i32_0 : i32, i32, i32
  }
}

</mosaic_0001>

<bundles_post_ra>
// kernel: tpu_custom_call.1
= control target key start
LH: loop header
LB: loop body
LE: loop exit
PB: predicated region body
PF: predicated region fallthrough
CT: control target
= control target key end

     0   :  { %s789_s9 = smov 0   ;;  %s900_s0 = inlined_call_operand.vmem [shape: f32[4,8,48], index: 0, kind: input, shape index: {}]   ;;  %s901_s1 = inlined_call_operand.vmem [shape: f32[112,36], index: 1, kind: input, shape index: {}]   ;;  %s902_s2 = inlined_call_operand.vmem [shape: f32[4,8,6], index: 2, kind: output, shape index: {}]  }
   0x1 LB: > { %s658_s10 = sadd.s32 4294967295, %s765_s9   ;;  %p662_p0 = scmp.ge.s32.totalorder %s765_s9, 1  ;;  %s765_s9 = sphi %s789_s9, %s12_s9  }
   0x2   : > { %p111_p1 = scmp.lt.s32.totalorder %s765_s9, 5 }
   0x4   : > { %p112_p2 = pnand %p662_p0, %p111_p1 }
   0x5   : > { %p131_p3 = scmp.lt.s32.totalorder (!%p112_p2), %s658_s10, 3  ;;  %s769_s27 = smov (!%p112_p2), 36  }
   0x6   : > { %115 = sbr.rel (%p112_p2) target bundleno = 1762 (0x6e2), region = 28  ;;  %s771_s12 = smov (!%p112_p2), 92  }
   0x7   : > { %s772_s18 = smov (!%p112_p2), 12   ;;  %s773_s23 = smov (!%p112_p2), 116  }
   0xb   : > { %v145_v0 = vld [vmem:[%s901_s1 + $0x28] sm:$0xff]  ;;  %v767_v1 = vmov 0.0   ;;  %v144_v2 = vld [vmem:[%s901_s1 + $0x20] sm:$0xff]  ;;  %vm768_vm0 = vmmov 0   ;;  %s904_s10 = smov (!%p131_p3, %s658_s10), 3  ;;  %v143_v3 = vld [vmem:[%s901_s1 + $0x18] sm:$0xff]  ;;  %v320_v28 = vlaneseq }
   0xc   : > { %695 = vmatprep.subr.mxu0 %v767_v1  ;;  %707 = vmatprep.mubr.msk.f32.mxu0 %vm768_vm0, %v767_v1  ;;  %s663_s17 = sshll.u32 %s904_s10, 3  ;;  %v142_v4 = vld [vmem:[%s901_s1 + $0x10] sm:$0xff]  ;;  %v141_v5 = vld [vmem:[%s901_s1 + $0x8] sm:$0xff]  ;;  %v140_v6 = vld [vmem:[%s901_s1] sm:$0xff]  ;;  %vm146_vm1 = vcmask 392192   ;;  %vm227_vm2 = vcmask 293888  }
   0xd   : > { %696 = vmatpush3.msra.mxu0 %v145_v0  ;;  %710 = vmatprep.subr.mxu1 %v767_v1  ;;  %s134_s24 = scalar_lea.vmem %s900_s0, %s663_s17  ;;  %vm229_vm3 = vcmask 64512   ;;  %v770_v13 = vmov 1.0   ;;  %v335_v22 = vld [vmem:[%s901_s1 + $0x50] sm:$0xf]  ;;  %vm339_vm4 = vcmask 1043456   ;;  %v334_v23 = vld [vmem:[%s901_s1 + $0x48] sm:$0xff]  ;;  %s138_s4 = scalar_lea.vmem %s902_s2, %s663_s17 }
   0xe   : > { %697 = vmatprep.subr.mxu0 %v767_v1  ;;  %712 = vmatprep.mubr.msk.f32.mxu1 %vm768_vm0, %v767_v1  ;;  %v139_v7 = vld [vmem:[%s134_s24] sm:$0xff]  ;;  %v332_v25 = vld [vmem:[%s901_s1 + $0x38] sm:$0xff]  ;;  %v331_v26 = vld [vmem:[%s901_s1 + $0x30] sm:$0xff]  ;;  %v321_v29 = vshrl.u32 %v320_v28, 7  ;;  %vm420_vm5 = vcmask 97280   ;;  %vm603_vm6 = vcmask 48128  }
   0xf   : > { %698 = vmatpush3.msra.mxu0 %v144_v2  ;;  %v333_v24 = vld [vmem:[%s901_s1 + $0x40] sm:$0xff]  ;;  %v220_v30 = vld [vmem:[%s901_s1 + $0x68] sm:$0x1]  ;;  %v221_v34 = vld [vmem:[%s901_s1 + $0x69] sm:$0x1] }
  0x10   : > { %699 = vmatprep.subr.mxu0 %v767_v1  ;;  %v322_v31 = vsub.s32 0, %v321_v29  ;;  %v521_v55 = vld [vmem:[%s901_s1 + $0x60] sm:$0xf]  ;;  %v520_v56 = vld [vmem:[%s901_s1 + $0x58] sm:$0xff]  ;;  %v413_v58 = vld [vmem:[%s901_s1 + $0x6a] sm:$0x1] }
  0x11   : > { %700 = vmatpush3.msra.mxu0 %v143_v3  ;;  %v414_v61 = vld [vmem:[%s901_s1 + $0x6b] sm:$0x1] }
  0x12   : > { %701 = vmatprep.subr.mxu0 %v767_v1 }
  0x13   : > { %702 = vmatpush3.msra.mxu0 %v142_v4 }
  0x14   : > { %703 = vmatprep.subr.mxu0 %v767_v1 }
  0x15   : > { %704 = vmatpush3.msra.mxu0 %v141_v5  ;;  %v670_v5 = vld [vmem:[%s901_s1 + $0x6c] ss:$0 sm:$0xff] }
  0x16   : > { %705 = vmatprep.subr.mxu0 %v767_v1 }
  0x17   : > { %706 = vmatpush3.msra.mxu0 %v140_v6 }
  0x18   : > { %708 = vmatmul.mubr.msk.f32.vlgmr.msra.gmra.mxu0 %vm146_vm1, %v139_v7  ;;  %728 = vmatprep.subr.mxu0 %v767_v1 }
  0x19   : > { %730 = vmatprep.mubr.msk.f32.mxu0 %vm768_vm0, %v767_v1 }
  0xd8   : > { %v216_v8 = vpop.f32.mrf.mxu0 }
  0xd9   : > { %v222_v9 = vmul.f32 %v216_v8, %v216_v8 }
  0xda   : > { %v709_v10 = vpop.f32.mrf.mxu0 }
  0xdb   : > { %224 = vrot.lane.b32.xlu0 %v222_v9, %s769_s27 }
 0x14d   : > { %v225_v11 = vpop.permute.xlu0 %224 }
 0x14e   : > { %v228_v12 = vsel %vm227_vm2, %v216_v8, %v225_v11 }
 0x14f   : > { %711 = vmatpush3.msra.mxu1 %v228_v12 }
 0x150   : > { %713 = vmatmul.mubr.msk.f32.vlgmr.msra.gmra.mxu1 %vm229_vm3, %v770_v13  ;;  %715 = vmatprep.subr.mxu1 %v767_v1 }
 0x151   : > { %725 = vmatprep.mubr.msk.f32.mxu1 %vm768_vm0, %v767_v1  ;;  %716 = vmatpush3.msk.msra.mxu1 %vm339_vm4, %v335_v22 }
 0x152   : > { %717 = vmatprep.subr.mxu1 %v767_v1 }
 0x153   : > { %718 = vmatpush3.msra.mxu1 %v334_v23 }
 0x154   : > { %719 = vmatprep.subr.mxu1 %v767_v1 }
 0x155   : > { %720 = vmatpush3.msra.mxu1 %v333_v24 }
 0x156   : > { %721 = vmatprep.subr.mxu1 %v767_v1 }
 0x157   : > { %722 = vmatpush3.msra.mxu1 %v332_v25 }
 0x158   : > { %723 = vmatprep.subr.mxu1 %v767_v1 }
 0x159   : > { %724 = vmatpush3.msra.mxu1 %v331_v26 }
 0x15a   : > { %733 = vmatprep.subr.mxu1 %v767_v1 }
 0x210   : > { %v299_v14 = vpop.f32.mrf.mxu1 }
 0x211   : > { %v303_v15 = vmul.f32 0.125, %v299_v14 }
 0x212   : > { %v714_v16 = vpop.f32.mrf.mxu1 }
 0x213   : > { %v304_v17 = vmul.f32 %v303_v15, %v303_v15 }
 0x215   : > { %306 = vrot.lane.b32.xlu0 %v304_v17, %s769_s27 }
 0x287   : > { %v307_v18 = vpop.permute.xlu0 %306 }
 0x288   : > { %v309_v19 = vsub.f32 %v303_v15, %v307_v18 }
 0x28a   : > { %v310_v20 = vmax.f32 %v309_v19, 0.0 }
 0x28c   : > { %v311_v21 = vadd.f32 1e-05, %v310_v20 }
 0x28e   : > { %755 = vrsqrt.f32 %v311_v21 }
 0x29b   : > { %v756_v27 = vpop.eup %755 }
 0x29c   : > { %314 = vrot.lane.b32.xlu1 %v756_v27, %s771_s12 }
 0x30e   : > { %v315_v32 = vpop.permute.xlu1 %314 }
 0x30f   : > { %v317_v33 = vmul.f32 %v315_v32, %v220_v30 }
 0x311   : > { %v318_v35 = vmul.f32 %v317_v33, %v303_v15  ;;  %v323_v36 = vrot.slane %v317_v33, %v322_v31 }
 0x313   : > { %v319_v37 = vsub.f32 %v221_v34, %v318_v35  ;;  %v324_v38 = vmul.f32 %v323_v36, %v216_v8 }
 0x315   : > { %v328_v39 = vrot.slane %v319_v37, %v322_v31 }
 0x317   : > { %v329_v40 = vadd.f32 %v328_v39, %v324_v38 }
 0x319   : > { %v330_v41 = vmax.f32 %v329_v40, 0.0 }
 0x31b   : > { %726 = vmatmul.mubr.msk.f32.vlgmr.msra.gmra.mxu1 %vm227_vm2, %v330_v41 }
 0x31c   : > { %737 = vmatprep.mubr.msk.f32.mxu1 %vm768_vm0, %v767_v1  ;;  %734 = vmatpush3.msk.msra.mxu1 %vm339_vm4, %v521_v55 }
 0x31d   : > { %735 = vmatprep.subr.mxu1 %v767_v1 }
 0x31e   : > { %736 = vmatpush3.msra.mxu1 %v520_v56 }
 0x3db   : > { %v409_v42 = vpop.f32.mrf.mxu1 }
 0x3dc   : > { %v415_v43 = vmul.f32 %v409_v42, %v409_v42 }
 0x3dd   : > { %v727_v44 = vpop.f32.mrf.mxu1 }
 0x3de   : > { %417 = vrot.lane.b32.xlu1 %v415_v43, %s772_s18 }
 0x450   : > { %v418_v45 = vpop.permute.xlu1 %417 }
 0x451   : > { %v421_v46 = vsel %vm420_vm5, %v409_v42, %v418_v45 }
 0x452   : > { %729 = vmatpush3.msra.mxu0 %v421_v46 }
 0x453   : > { %731 = vmatmul.mubr.msk.f32.vlgmr.msra.gmra.mxu0 %vm229_vm3, %v770_v13 }
 0x513   : > { %v488_v47 = vpop.f32.mrf.mxu0 }
 0x514   : > { %v492_v48 = vmul.f32 0.125, %v488_v47 }
 0x515   : > { %v732_v49 = vpop.f32.mrf.mxu0 }
 0x516   : > { %v493_v50 = vmul.f32 %v492_v48, %v492_v48 }
 0x518   : > { %495 = vrot.lane.b32.xlu0 %v493_v50, %s772_s18 }
 0x58a   : > { %v496_v51 = vpop.permute.xlu0 %495 }
 0x58b   : > { %v498_v52 = vsub.f32 %v492_v48, %v496_v51 }
 0x58d   : > { %v499_v53 = vmax.f32 %v498_v52, 0.0 }
 0x58f   : > { %v500_v54 = vadd.f32 1e-05, %v499_v53 }
 0x591   : > { %757 = vrsqrt.f32 %v500_v54 }
 0x59e   : > { %v758_v57 = vpop.eup %757 }
 0x59f   : > { %503 = vrot.lane.b32.xlu1 %v758_v57, %s773_s23 }
 0x611   : > { %v504_v59 = vpop.permute.xlu1 %503 }
 0x612   : > { %v506_v60 = vmul.f32 %v504_v59, %v413_v58 }
 0x614   : > { %v507_v62 = vmul.f32 %v506_v60, %v492_v48  ;;  %v512_v63 = vrot.slane %v506_v60, %v322_v31 }
 0x616   : > { %v508_v0 = vsub.f32 %v414_v61, %v507_v62  ;;  %v513_v1 = vmul.f32 %v512_v63, %v409_v42 }
 0x618   : > { %v517_v2 = vrot.slane %v508_v0, %v322_v31 }
 0x61a   : > { %v518_v3 = vadd.f32 %v517_v2, %v513_v1 }
 0x61c   : > { %v519_v4 = vmax.f32 %v518_v3, 0.0 }
 0x61e   : > { %738 = vmatmul.mubr.msk.f32.vlgmr.msra.gmra.mxu1 %vm420_vm5, %v519_v4 }
 0x6de   : > { %v599_v6 = vpop.f32.mrf.mxu1 }
 0x6df   : > { %v600_v7 = vadd.f32 %v670_v5, %v599_v6 }
 0x6e0   : > { %v739_v8 = vpop.f32.mrf.mxu1 }
 0x6e1   : > { %604 = vst.msk [vmem:[%s138_s4] sm:$0xff] %vm603_vm6, %v600_v7 }
 0x6e2 PF: > { %s12_s9 = sadd.s32 1, %s765_s9  }
 0x6e3   : > { %p9_p4 = scmp.ge.s32.totalorder %s12_s9, 6  }
 0x6e5   :  { %11 = sbr.rel (!%p9_p4) target bundleno = 1 (0x1), region = 58 }

</bundles_post_ra>
